<compile_context>
chip_gen: v6e
topology: v6e:2x2x1
jax: 0.10.0
libtpu: 0.0.40
codegen_flags: <defaults>
</compile_context>

<pallas_src>
import functools
import math

import jax
import jax.numpy as jnp
from jax.experimental import pallas as pl
from jax.experimental.pallas import tpu as pltpu


def _rande_ape_kernel(pos_ref, p_ref, o_ref, *, content_scale):
    # pos_ref: (TILE_S, dim)          f32 positional-embedding tile
    # p_ref  : (TILE_B, TILE_S, dim)  patches block (model dtype)
    # o_ref  : (TILE_B, TILE_S, dim)  output block (model dtype)
    p = p_ref[...].astype(jnp.float32)
    # Broadcast over the leading block dim is free vreg reuse (no relayout).
    o_ref[...] = (p * content_scale + pos_ref[...][None, :, :]).astype(o_ref.dtype)


def _pick_tiles(B, S_pad, dim, itemsize, target_block_bytes=4 * 1024 * 1024):
    """Pick (tile_b, tile_s): tile_s a multiple-of-8 divisor of S_pad, tile_b a
    divisor of B, so the patches block is as large as possible but stays at or
    below `target_block_bytes`."""
    row_bytes = dim * itemsize
    # Largest multiple-of-8 divisor of S_pad whose (tile_s, dim) slab fits.
    max_rows = max(8, target_block_bytes // max(1, row_bytes))
    tile_s = 8
    for cand in range(8, S_pad + 1, 8):
        if S_pad % cand == 0 and cand <= max_rows:
            tile_s = cand
    # Largest divisor of B keeping the full (tile_b, tile_s, dim) block <= target.
    block_row_bytes = tile_s * row_bytes
    max_b = max(1, target_block_bytes // max(1, block_row_bytes))
    tile_b = 1
    for cand in range(1, B + 1):
        if B % cand == 0 and cand <= max_b:
            tile_b = cand
    return tile_b, tile_s


def rande_ape_v0(patches, *, max_global_shift=0.0, max_local_shift=0.0,
                 max_global_scaling=1.0):
    """Eval-mode forward of RandeAPEv0 (batch_first=True).

    patches: (B, H, W, dim) channels-last. Returns (B, H*W, dim) in the input
    dtype, matching `.reshape(-1, h*w, dim)` of the PyTorch forward.
    """
    B, H, W, dim = patches.shape
    assert dim % 2 == 0, "dim must be even"
    half = dim // 2
    S = H * W
    content_scale = float(math.sqrt(dim))
    itemsize = jnp.dtype(patches.dtype).itemsize

    # ---- Precompute the (S, dim) positional embedding in the wrapper (f32).
    # Deterministic buffers from __init__.
    rho = 10.0 ** jnp.linspace(0.0, 1.0, half)
    ar = jnp.arange(half, dtype=jnp.float32)
    w_x = (rho * jnp.cos(ar)).astype(jnp.float32)
    w_y = (rho * jnp.sin(ar)).astype(jnp.float32)
    lin_x = jnp.linspace(-1.0, 1.0, H, dtype=jnp.float32)   # x <-> H axis
    lin_y = jnp.linspace(-1.0, 1.0, W, dtype=jnp.float32)   # y <-> W axis
    phase = jnp.pi * (w_x[None, None, :] * lin_x[:, None, None]
                      + w_y[None, None, :] * lin_y[None, :, None])  # (H, W, half)
    pos_emb = jnp.concatenate([jnp.cos(phase), jnp.sin(phase)],
                              axis=-1).reshape(S, dim).astype(jnp.float32)

    patches_flat = patches.reshape(B, S, dim)

    # ---- Pad the sequence axis to a multiple of 8 (the (8,128) block rule),
    # instead of falling back to a full-(S, dim) block.
    S_pad = ((S + 7) // 8) * 8
    if S_pad != S:
        patches_flat = jnp.pad(patches_flat, ((0, 0), (0, S_pad - S), (0, 0)))
        pos_emb = jnp.pad(pos_emb, ((0, S_pad - S), (0, 0)))

    # ---- Tile sizes + honest VMEM accounting (double-buffered in/out + pos).
    tile_b, tile_s = _pick_tiles(B, S_pad, dim, itemsize)
    num_s_tiles = S_pad // tile_s
    num_b_tiles = B // tile_b

    in_block_bytes = tile_b * tile_s * dim * itemsize
    out_block_bytes = in_block_bytes
    pos_block_bytes = tile_s * dim * 4
    vmem_need = 2 * in_block_bytes + 2 * out_block_bytes + 2 * pos_block_bytes
    vmem_limit = int(min(max(2 * vmem_need + (8 << 20), 32 << 20), 56 << 20))

    total_io_bytes = (B * S_pad * dim * itemsize) * 2 + S_pad * dim * 4
    cost = pl.CostEstimate(flops=2 * B * S_pad * dim, transcendentals=0,
                           bytes_accessed=total_io_bytes)

    kernel = functools.partial(_rande_ape_kernel, content_scale=content_scale)

    out = pl.pallas_call(
        kernel,
        out_shape=jax.ShapeDtypeStruct((B, S_pad, dim), patches.dtype),
        grid_spec=pltpu.PrefetchScalarGridSpec(
            num_scalar_prefetch=0,
            # b-tiles innermost: pos block index (depends only on s) is
            # unchanged across consecutive steps -> Pallas skips its re-DMA.
            grid=(num_s_tiles, num_b_tiles),
            in_specs=[
                pl.BlockSpec((tile_s, dim), lambda s, b: (s, 0)),          # pos
                pl.BlockSpec((tile_b, tile_s, dim), lambda s, b: (b, s, 0)),  # patches
            ],
            out_specs=pl.BlockSpec((tile_b, tile_s, dim),
                                   lambda s, b: (b, s, 0)),
        ),
        compiler_params=pltpu.CompilerParams(
            dimension_semantics=("parallel", "parallel"),
            vmem_limit_bytes=vmem_limit),
        cost_estimate=cost,
    )(pos_emb, patches_flat)

    if S_pad != S:
        out = out[:, :S, :]
    return out


def rande_ape_v0_reference(patches):
    """Pure-JAX reference mirroring the PyTorch forward (eval mode)."""
    B, H, W, dim = patches.shape
    half = dim // 2
    rho = 10.0 ** jnp.linspace(0.0, 1.0, half)
    ar = jnp.arange(half, dtype=jnp.float32)
    w_x = rho * jnp.cos(ar)
    w_y = rho * jnp.sin(ar)
    content_scale = jnp.sqrt(jnp.float32(dim))

    x = jnp.zeros((B, H, W)) + jnp.linspace(-1.0, 1.0, H)[None, :, None]
    y = jnp.zeros((B, H, W)) + jnp.linspace(-1.0, 1.0, W)[None, None, :]
    phase = jnp.pi * (w_x * x[..., None] + w_y * y[..., None])
    pos_emb = jnp.concatenate([jnp.cos(phase), jnp.sin(phase)], axis=-1)
    out = patches.astype(jnp.float32) * content_scale + pos_emb
    return out.reshape(-1, H * W, dim).astype(patches.dtype)


if __name__ == "__main__":
    key = jax.random.PRNGKey(0)
    B, H, W, dim = 2, 8, 8, 32
    patches = jax.random.normal(key, (B, H, W, dim), dtype=jnp.float32)

    out = jax.block_until_ready(rande_ape_v0(patches))

    ref = rande_ape_v0_reference(patches)
    assert out.shape == (B, H * W, dim), out.shape
    assert jnp.allclose(out, ref, atol=1e-4, rtol=1e-4), float(
        jnp.max(jnp.abs(out - ref)))

    print("KERNEL_OK")
</pallas_src>

<mosaic_0001>
module attributes {stable_mosaic.version = 11 : i64} {
  func.func @_rande_ape_kernel(%arg0: i32, %arg1: i32, %arg2: memref<64x32xf32, #tpu.memory_space<vmem>>, %arg3: memref<2x64x32xf32, #tpu.memory_space<vmem>>, %arg4: memref<2x64x32xf32, #tpu.memory_space<vmem>>) attributes {dimension_semantics = [#tpu.dimension_semantics<parallel>, #tpu.dimension_semantics<parallel>], iteration_bounds = array<i64: 1, 1>, scalar_prefetch = 0 : i64, scratch_operands = 0 : i64, tpu.core_type = #tpu.core_type<tc>, window_params = [{transform_indices = @transform_0, window_bounds = array<i64: 64, 32>}, {transform_indices = @transform_1, window_bounds = array<i64: 2, 64, 32>}, {transform_indices = @transform_2, window_bounds = array<i64: 2, 64, 32>}]} {
    %c0 = arith.constant 0 : index
    %c0_0 = arith.constant 0 : index
    %c0_1 = arith.constant 0 : index
    %0 = vector.load %arg3[%c0, %c0_0, %c0_1] : memref<2x64x32xf32, #tpu.memory_space<vmem>>, vector<2x64x32xf32>
    %cst = arith.constant 5.65685415 : f32
    %1 = vector.broadcast %cst : f32 to vector<2x64x32xf32>
    %2 = arith.mulf %0, %1 : vector<2x64x32xf32>
    %c0_2 = arith.constant 0 : index
    %c0_3 = arith.constant 0 : index
    %3 = vector.load %arg2[%c0_2, %c0_3] : memref<64x32xf32, #tpu.memory_space<vmem>>, vector<64x32xf32>
    %4 = vector.shape_cast %3 : vector<64x32xf32> to vector<1x64x32xf32>
    %5 = vector.broadcast %4 : vector<1x64x32xf32> to vector<2x64x32xf32>
    %6 = arith.addf %2, %5 : vector<2x64x32xf32>
    %c0_4 = arith.constant 0 : index
    %c0_5 = arith.constant 0 : index
    %c0_6 = arith.constant 0 : index
    %7 = vector.load %arg4[%c0_4, %c0_5, %c0_6] : memref<2x64x32xf32, #tpu.memory_space<vmem>>, vector<2x64x32xf32>
    tpu.vector_store %arg4[%c0_4, %c0_5, %c0_6], %6 {strides = array<i32>} : memref<2x64x32xf32, #tpu.memory_space<vmem>>, vector<2x64x32xf32>,
    return
  }
  func.func @transform_0(%arg0: i32, %arg1: i32) -> (i32, i32) {
    %c0_i32 = arith.constant 0 : i32
    %c0_i32_0 = arith.constant 0 : i32
    return %arg0, %c0_i32 : i32, i32
  }
  func.func @transform_1(%arg0: i32, %arg1: i32) -> (i32, i32, i32) {
    %c0_i32 = arith.constant 0 : i32
    %c0_i32_0 = arith.constant 0 : i32
    return %arg1, %arg0, %c0_i32 : i32, i32, i32
  }
  func.func @transform_2(%arg0: i32, %arg1: i32) -> (i32, i32, i32) {
    %c0_i32 = arith.constant 0 : i32
    %c0_i32_0 = arith.constant 0 : i32
    return %arg1, %arg0, %c0_i32 : i32, i32, i32
  }
}

</mosaic_0001>

<bundles_post_ra>
// kernel: tpu_custom_call.1
= control target key start
LH: loop header
LB: loop body
LE: loop exit
PB: predicated region body
PF: predicated region fallthrough
CT: control target
= control target key end

     0   :  { %vm67_vm0 = vcmask 261120   ;;  %s239_s0 = inlined_call_operand.vmem [shape: f32[64,32], index: 0, kind: input, shape index: {}]   ;;  %s240_s1 = inlined_call_operand.vmem [shape: f32[2,64,32], index: 1, kind: input, shape index: {}]   ;;  %s241_s2 = inlined_call_operand.vmem [shape: f32[2,64,32], index: 2, kind: output, shape index: {}]  }
   0x1   :  { %v11_v0 = vld [vmem:[%s240_s1] sm:$0xff]  ;;  %v12_v2 = vld [vmem:[%s240_s1 + $0x8] sm:$0xff]  ;;  %v13_v6 = vld [vmem:[%s240_s1 + $0x10] sm:$0xff] }
   0x2   :  { %v43_v1 = vld [vmem:[%s239_s0] sm:$0xff]  ;;  %v27_v3 = vmul.f32 5.656854, %v11_v0  ;;  %v28_v4 = vmul.f32 5.656854, %v12_v2  ;;  %v44_v5 = vld [vmem:[%s239_s0 + $0x8] sm:$0xff] }
   0x3   :  { %v29_v7 = vmul.f32 5.656854, %v13_v6  ;;  %v45_v8 = vld [vmem:[%s239_s0 + $0x10] sm:$0xff]  ;;  %v14_v9 = vld [vmem:[%s240_s1 + $0x18] sm:$0xff]  ;;  %v15_v14 = vld [vmem:[%s240_s1 + $0x20] sm:$0xff] }
   0x4   :  { %v46_v10 = vld [vmem:[%s239_s0 + $0x18] sm:$0xff]  ;;  %v51_v11 = vadd.f32 %v43_v1, %v27_v3  ;;  %v52_v12 = vadd.f32 %v44_v5, %v28_v4  ;;  %v30_v13 = vmul.f32 5.656854, %v14_v9  ;;  %v47_v15 = vld [vmem:[%s239_s0 + $0x20] sm:$0xff]  ;;  %v16_v16 = vld [vmem:[%s240_s1 + $0x28] sm:$0xff] }
   0x5   :  { %v53_v17 = vadd.f32 %v45_v8, %v29_v7  ;;  %v31_v18 = vmul.f32 5.656854, %v15_v14  ;;  %v32_v19 = vmul.f32 5.656854, %v16_v16  ;;  %v48_v20 = vld [vmem:[%s239_s0 + $0x28] sm:$0xff]  ;;  %v17_v21 = vld [vmem:[%s240_s1 + $0x30] sm:$0xff] }
   0x6   :  { %68 = vst.msk [vmem:[%s241_s2] sm:$0xff] %vm67_vm0, %v51_v11  ;;  %69 = vst.msk [vmem:[%s241_s2 + $0x8] sm:$0xff] %vm67_vm0, %v52_v12  ;;  %v54_v22 = vadd.f32 %v46_v10, %v30_v13  ;;  %v33_v23 = vmul.f32 5.656854, %v17_v21  ;;  %v49_v24 = vld [vmem:[%s239_s0 + $0x30] sm:$0xff]  ;;  %v18_v25 = vld [vmem:[%s240_s1 + $0x38] sm:$0xff] }
   0x7   :  { %v50_v26 = vld [vmem:[%s239_s0 + $0x38] sm:$0xff]  ;;  %70 = vst.msk [vmem:[%s241_s2 + $0x10] sm:$0xff] %vm67_vm0, %v53_v17  ;;  %v55_v27 = vadd.f32 %v47_v15, %v31_v18  ;;  %v56_v28 = vadd.f32 %v48_v20, %v32_v19  ;;  %v34_v29 = vmul.f32 5.656854, %v18_v25  ;;  %v19_v30 = vld [vmem:[%s240_s1 + $0x40] sm:$0xff]  ;;  %v20_v31 = vld [vmem:[%s240_s1 + $0x48] sm:$0xff] }
   0x8   :  { %v21_v32 = vld [vmem:[%s240_s1 + $0x50] sm:$0xff]  ;;  %71 = vst.msk [vmem:[%s241_s2 + $0x18] sm:$0xff] %vm67_vm0, %v54_v22  ;;  %v57_v33 = vadd.f32 %v49_v24, %v33_v23  ;;  %v35_v34 = vmul.f32 5.656854, %v19_v30  ;;  %v36_v35 = vmul.f32 5.656854, %v20_v31 }
   0x9   :  { %v37_v36 = vmul.f32 5.656854, %v21_v32  ;;  %72 = vst.msk [vmem:[%s241_s2 + $0x20] sm:$0xff] %vm67_vm0, %v55_v27  ;;  %73 = vst.msk [vmem:[%s241_s2 + $0x28] sm:$0xff] %vm67_vm0, %v56_v28  ;;  %v58_v37 = vadd.f32 %v50_v26, %v34_v29  ;;  %v22_v38 = vld [vmem:[%s240_s1 + $0x58] sm:$0xff]  ;;  %v23_v39 = vld [vmem:[%s240_s1 + $0x60] sm:$0xff] }
   0xa   :  { %v24_v40 = vld [vmem:[%s240_s1 + $0x68] sm:$0xff]  ;;  %74 = vst.msk [vmem:[%s241_s2 + $0x30] sm:$0xff] %vm67_vm0, %v57_v33  ;;  %v59_v41 = vadd.f32 %v43_v1, %v35_v34  ;;  %v60_v42 = vadd.f32 %v44_v5, %v36_v35  ;;  %v38_v44 = vmul.f32 5.656854, %v22_v38  ;;  %v25_v45 = vld [vmem:[%s240_s1 + $0x70] sm:$0xff]  ;;  %v26_v46 = vld [vmem:[%s240_s1 + $0x78] sm:$0xff] }
   0xb   :  { %v61_v43 = vadd.f32 %v45_v8, %v37_v36  ;;  %75 = vst.msk [vmem:[%s241_s2 + $0x38] sm:$0xff] %vm67_vm0, %v58_v37  ;;  %v39_v47 = vmul.f32 5.656854, %v23_v39  ;;  %v40_v48 = vmul.f32 5.656854, %v24_v40 }
   0xc   :  { %v41_v49 = vmul.f32 5.656854, %v25_v45  ;;  %76 = vst.msk [vmem:[%s241_s2 + $0x40] sm:$0xff] %vm67_vm0, %v59_v41  ;;  %77 = vst.msk [vmem:[%s241_s2 + $0x48] sm:$0xff] %vm67_vm0, %v60_v42  ;;  %v62_v50 = vadd.f32 %v46_v10, %v38_v44  ;;  %v42_v51 = vmul.f32 5.656854, %v26_v46 }
   0xd   :  { %78 = vst.msk [vmem:[%s241_s2 + $0x50] sm:$0xff] %vm67_vm0, %v61_v43  ;;  %v63_v52 = vadd.f32 %v47_v15, %v39_v47  ;;  %v64_v53 = vadd.f32 %v48_v20, %v40_v48 }
   0xe   :  { %v65_v54 = vadd.f32 %v49_v24, %v41_v49  ;;  %79 = vst.msk [vmem:[%s241_s2 + $0x58] sm:$0xff] %vm67_vm0, %v62_v50  ;;  %v66_v55 = vadd.f32 %v50_v26, %v42_v51 }
   0xf   :  { %80 = vst.msk [vmem:[%s241_s2 + $0x60] sm:$0xff] %vm67_vm0, %v63_v52  ;;  %81 = vst.msk [vmem:[%s241_s2 + $0x68] sm:$0xff] %vm67_vm0, %v64_v53 }
  0x10   :  { %82 = vst.msk [vmem:[%s241_s2 + $0x70] sm:$0xff] %vm67_vm0, %v65_v54  ;;  %83 = vst.msk [vmem:[%s241_s2 + $0x78] sm:$0xff] %vm67_vm0, %v66_v55 }

</bundles_post_ra>
